<compile_context>
chip_gen: v6e
topology: v6e:2x2x1
jax: 0.10.0
libtpu: 0.0.40
codegen_flags: <defaults>
</compile_context>

<pallas_src>
import functools
import numpy as np
import jax
import jax.numpy as jnp
from jax.experimental import pallas as pl
from jax.experimental.pallas import tpu as pltpu

EPS = 1e-5  # nn.BatchNorm2d default eps
VMEM_LIMIT = 32 * 1024 * 1024  # safe on v5e/v6e/v7x; our tiles use far less


def _pad_to(v, m):
    return ((v + m - 1) // m) * m


# -------------------- Pallas kernels --------------------

def _conv3x3s1_kernel(a_hbm, w_ref, mask_ref, o_ref, sum_ref, sq_ref,
                      a_vmem, sem, *, tm, offsets):
    """Fused im2col + matmul for a 3x3 stride-1 'same' conv.

    a_hbm: flattened zero-padded activation (rows, Cin) in HBM (pl.ANY).
    For output-row tile i we DMA rows [i*tm, i*tm + tm + halo) once; the 9 taps are
    static slices of that VMEM slab at flat offsets {di*Wp + dj}.  Accumulation is f32
    in registers; the bf16 conv output plus masked per-tile BN partial sums are emitted.
    """
    i = pl.program_id(0)
    slab = a_vmem.shape[0]
    cp = pltpu.make_async_copy(a_hbm.at[pl.ds(i * tm, slab), :], a_vmem, sem)
    cp.start()
    cp.wait()

    acc = jnp.dot(a_vmem[pl.ds(offsets[0], tm), :], w_ref[0],
                  preferred_element_type=jnp.float32)
    for t in range(1, len(offsets)):
        off = offsets[t]
        acc = acc + jnp.dot(a_vmem[pl.ds(off, tm), :], w_ref[t],
                            preferred_element_type=jnp.float32)

    o_ref[...] = acc.astype(o_ref.dtype)

    # BN statistics: mask out padded / out-of-image ("garbage") output rows.
    m = mask_ref[...]                      # (tm, 1) f32 in {0,1}
    masked = acc * m
    sum_ref[...] = jnp.sum(masked, axis=0).reshape(1, 1, -1)
    sq_ref[...] = jnp.sum(masked * acc, axis=0).reshape(1, 1, -1)


def _matmul_stats_kernel(a_ref, b_ref, o_ref, sum_ref, sq_ref, acc_ref):
    """K-tiled matmul with an f32 VMEM accumulator and bf16 output.
    At the last K step it also emits per-N-block column sums / sums-of-squares
    (partial BatchNorm statistics for this M tile)."""
    k = pl.program_id(2)
    prod = jnp.dot(a_ref[...], b_ref[...], preferred_element_type=jnp.float32)

    @pl.when(k == 0)
    def _():
        acc_ref[...] = prod

    @pl.when(k > 0)
    def _():
        acc_ref[...] += prod

    # NOTE: o/sum/sq blocks are written only at the last K step.  This is correct because
    # their block index is K-invariant (single writeback when the block index changes);
    # do not reorder the grid or change these out_specs without revisiting this.
    @pl.when(k == pl.num_programs(2) - 1)
    def _():
        acc = acc_ref[...]
        o_ref[...] = acc.astype(o_ref.dtype)
        sum_ref[...] = jnp.sum(acc, axis=0).reshape(1, 1, -1)
        sq_ref[...] = jnp.sum(acc * acc, axis=0).reshape(1, 1, -1)


def _affine_kernel(x_ref, s_ref, b_ref, o_ref, *, relu):
    # y = x*scale + shift  (folded BatchNorm), optional ReLU; bf16 in/out, f32 math.
    y = x_ref[...].astype(jnp.float32) * s_ref[...] + b_ref[...]
    if relu:
        y = jnp.maximum(y, 0.0)
    o_ref[...] = y.astype(o_ref.dtype)


def _affine_add_relu_kernel(x_ref, r_ref, s_ref, b_ref, o_ref):
    # BasicBlock tail: relu(bn2(conv2) + identity)
    y = (x_ref[...].astype(jnp.float32) * s_ref[...] + b_ref[...]
         + r_ref[...].astype(jnp.float32))
    o_ref[...] = jnp.maximum(y, 0.0).astype(o_ref.dtype)


def _max9_kernel(*refs):
    # elementwise max over the 9 shifted 3x3-window views (passed as 9 inputs)
    o_ref = refs[-1]
    m = refs[0][...]
    for r in refs[1:-1]:
        m = jnp.maximum(m, r[...])
    o_ref[...] = m


# -------------------- fused 3x3 stride-1 conv --------------------

def _fused_conv3x3_s1(x, wd):
    """x: (N,H,W,Cin); wd['w']: (9, Cin, Np) bf16.  Returns (conv (N,H,W,Cout) bf16,
    col_sum (Cout,), col_sumsq (Cout,)) with stats over the N*H*W valid positions."""
    N, H, W, C = x.shape
    Cout = wd["Cout"]
    wmat = wd["w"]
    Np = wmat.shape[2]
    Hp, Wp = H + 2, W + 2

    xp = jnp.pad(x.astype(jnp.bfloat16), ((0, 0), (1, 1), (1, 1), (0, 0)))
    rows = N * Hp * Wp
    a = xp.reshape(rows, C)

    tm_cap = 1024 if C <= 128 else 512
    TM = min(tm_cap, _pad_to(rows, 16))
    gm = pl.cdiv(rows, TM)
    Mpad = gm * TM
    halo = 2 * Wp + 2                      # largest tap offset
    slab = _pad_to(TM + halo, 16)
    a = jnp.pad(a, ((0, Mpad + (slab - TM) - rows), (0, 0)))  # zero rows for the halo

    TN = 256 if Np % 256 == 0 else 128
    gn = Np // TN

    # Row-validity mask (valid = real, in-image output position) for the BN statistics.
    r = jnp.arange(Mpad, dtype=jnp.int32)
    q = r % (Hp * Wp)
    mask = ((r < rows) & (q // Wp < H) & (q % Wp < W)).astype(jnp.float32)
    mask = mask.reshape(Mpad, 1)

    offsets = tuple(di * Wp + dj for di in range(3) for dj in range(3))
    kernel = functools.partial(_conv3x3s1_kernel, tm=TM, offsets=offsets)

    out, ssum, ssq = pl.pallas_call(
        kernel,
        grid=(gm, gn),
        in_specs=[
            pl.BlockSpec(memory_space=pl.ANY),                 # flattened padded act (HBM)
            pl.BlockSpec((9, C, TN), lambda i, j: (0, 0, j)),  # weights
            pl.BlockSpec((TM, 1), lambda i, j: (i, 0)),        # row-validity mask
        ],
        out_specs=(
            pl.BlockSpec((TM, TN), lambda i, j: (i, j)),
            pl.BlockSpec((1, 1, TN), lambda i, j: (i, 0, j)),
            pl.BlockSpec((1, 1, TN), lambda i, j: (i, 0, j)),
        ),
        out_shape=(
            jax.ShapeDtypeStruct((Mpad, Np), jnp.bfloat16),
            jax.ShapeDtypeStruct((gm, 1, Np), jnp.float32),
            jax.ShapeDtypeStruct((gm, 1, Np), jnp.float32),
        ),
        scratch_shapes=[
            pltpu.VMEM((slab, C), jnp.bfloat16),
            pltpu.SemaphoreType.DMA(()),
        ],
        compiler_params=pltpu.CompilerParams(
            dimension_semantics=("parallel", "parallel"),
            vmem_limit_bytes=VMEM_LIMIT),
    )(a, wmat, mask)

    conv = out[:rows].reshape(N, Hp, Wp, Np)[:, :H, :W, :Cout]
    col_sum = jnp.sum(ssum[:, 0, :Cout], axis=0)
    col_sq = jnp.sum(ssq[:, 0, :Cout], axis=0)
    return conv, col_sum, col_sq


# -------------------- im2col matmul path (stem / stride-2 / 1x1 convs) --------------------

def _choose_tk(Kp, cap=2048):
    """Largest multiple-of-128 divisor of Kp that is <= cap (Kp itself if it fits)."""
    if Kp <= cap:
        return Kp
    nk = Kp // 128
    for d in range(nk, 0, -1):
        if nk % d == 0 and 128 * d <= cap:
            return 128 * d
    return 128


def _pallas_conv_matmul(patches, wdict):
    """patches: (M, K) bf16 im2col matrix; wdict holds pre-padded bf16 (Kp, Np) weights.
    Returns (conv_out bf16 (M, Cout), col_sum (Cout,), col_sumsq (Cout,))."""
    K, Cout = wdict["K"], wdict["Cout"]
    b = wdict["wmat"]
    Kp, Np = b.shape
    M = patches.shape[0]

    TM = min(512, _pad_to(M, 16))
    Mp = _pad_to(M, TM)
    TN = 256 if Np % 256 == 0 else 128
    TK = _choose_tk(Kp)
    gm, gn, gk = Mp // TM, Np // TN, Kp // TK

    a_p = jnp.pad(patches, ((0, Mp - M), (0, Kp - K))).astype(jnp.bfloat16)

    out, ssum, ssq = pl.pallas_call(
        _matmul_stats_kernel,
        grid=(gm, gn, gk),
        in_specs=[
            pl.BlockSpec((TM, TK), lambda i, j, k: (i, k)),
            pl.BlockSpec((TK, TN), lambda i, j, k: (k, j)),
        ],
        out_specs=(
            pl.BlockSpec((TM, TN), lambda i, j, k: (i, j)),
            pl.BlockSpec((1, 1, TN), lambda i, j, k: (i, 0, j)),
            pl.BlockSpec((1, 1, TN), lambda i, j, k: (i, 0, j)),
        ),
        out_shape=(
            jax.ShapeDtypeStruct((Mp, Np), jnp.bfloat16),
            jax.ShapeDtypeStruct((gm, 1, Np), jnp.float32),
            jax.ShapeDtypeStruct((gm, 1, Np), jnp.float32),
        ),
        scratch_shapes=[pltpu.VMEM((TM, TN), jnp.float32)],
        compiler_params=pltpu.CompilerParams(
            dimension_semantics=("parallel", "parallel", "arbitrary"),
            vmem_limit_bytes=VMEM_LIMIT),
    )(a_p, b)

    conv = out[:M, :Cout]
    col_sum = jnp.sum(ssum[:, 0, :Cout], axis=0)
    col_sq = jnp.sum(ssq[:, 0, :Cout], axis=0)
    return conv, col_sum, col_sq


def _im2col(x, kh, kw, stride, pad):
    """x: (N,H,W,C) -> bf16 patches (N*Ho*Wo, kh*kw*C).  (XLA glue; see header TODO.)"""
    x = x.astype(jnp.bfloat16)
    N, H, W, C = x.shape
    xp = jnp.pad(x, ((0, 0), (pad, pad), (pad, pad), (0, 0)))
    Ho = (H + 2 * pad - kh) // stride + 1
    Wo = (W + 2 * pad - kw) // stride + 1
    cols = []
    for i in range(kh):
        for j in range(kw):
            cols.append(jax.lax.slice(
                xp, (0, i, j, 0),
                (N, i + (Ho - 1) * stride + 1, j + (Wo - 1) * stride + 1, C),
                (1, stride, stride, 1)))
    patches = jnp.stack(cols, axis=3).reshape(N * Ho * Wo, kh * kw * C)
    return patches, Ho, Wo


# -------------------- BatchNorm apply (+residual, +ReLU) --------------------

def _lane_fold(M, C):
    """Fold factor so the lane dim reaches 128 (unmasked vst) for channel-narrow stages."""
    if C < 128 and 128 % C == 0 and M % (128 // C) == 0:
        return 128 // C
    return 1


def _row_grid(R, max_tr=2048):
    """Row tiling for elementwise kernels (resolution-safe, ~0.5-1 MiB blocks)."""
    if R <= max_tr:
        return R, R, 1
    Rp = _pad_to(R, max_tr)
    return Rp, max_tr, Rp // max_tr


def _bn_apply(x_nhwc, col_sum, col_sq, gamma, beta, *, relu, residual=None):
    """Training-mode BatchNorm applied as a per-channel affine (stats come from the conv
    kernels), fused with optional residual add and ReLU.  bf16 in/out, lane-dense tiling."""
    N, H, W, C = x_nhwc.shape
    M = N * H * W
    mean = col_sum / M
    var = jnp.maximum(col_sq / M - mean * mean, 0.0)   # biased variance (PyTorch training mode)
    scale = gamma * jax.lax.rsqrt(var + EPS)
    shift = beta - mean * scale

    f = _lane_fold(M, C)
    Mf, Cf = M // f, C * f
    x2 = x_nhwc.reshape(Mf, Cf)
    s = jnp.tile(scale, f).reshape(1, Cf).astype(jnp.float32)
    b = jnp.tile(shift, f).reshape(1, Cf).astype(jnp.float32)

    Rp, TR, g = _row_grid(Mf)
    x2 = jnp.pad(x2, ((0, Rp - Mf), (0, 0)))

    row_spec = pl.BlockSpec((TR, Cf), lambda i: (i, 0))
    vec_spec = pl.BlockSpec((1, Cf), lambda i: (0, 0))
    cparams = pltpu.CompilerParams(dimension_semantics=("parallel",),
                                   vmem_limit_bytes=VMEM_LIMIT)

    if residual is None:
        out = pl.pallas_call(
            functools.partial(_affine_kernel, relu=relu),
            grid=(g,),
            in_specs=[row_spec, vec_spec, vec_spec],
            out_specs=row_spec,
            out_shape=jax.ShapeDtypeStruct((Rp, Cf), jnp.bfloat16),
            compiler_params=cparams,
        )(x2, s, b)
    else:
        r2 = jnp.pad(residual.reshape(Mf, Cf), ((0, Rp - Mf), (0, 0)))
        out = pl.pallas_call(
            _affine_add_relu_kernel,
            grid=(g,),
            in_specs=[row_spec, row_spec, vec_spec, vec_spec],
            out_specs=row_spec,
            out_shape=jax.ShapeDtypeStruct((Rp, Cf), jnp.bfloat16),
            compiler_params=cparams,
        )(x2, r2, s, b)

    return out[:Mf].reshape(N, H, W, C)


def conv_bn(x, wd, gamma, beta, *, stride, pad, relu, residual=None):
    """conv (fused 3x3-s1 kernel, or im2col MXU matmul) + BN apply (+res, +ReLU)."""
    if wd["kind"] == "fused3x3":
        conv, csum, csq = _fused_conv3x3_s1(x, wd)           # stride=1, pad=1 implied
    else:
        patches, Ho, Wo = _im2col(x, wd["kh"], wd["kw"], stride, pad)
        conv, csum, csq = _pallas_conv_matmul(patches, wd)
        conv = conv.reshape(x.shape[0], Ho, Wo, wd["Cout"])
    return _bn_apply(conv, csum, csq, gamma, beta, relu=relu, residual=residual)


# -------------------- max-pool --------------------

def maxpool_3x3_s2(x):
    # TODO(synk): the 9 window views are still materialized by XLA slices; a manual-DMA
    # phase-decomposed gather kernel would cut this stage's HBM traffic ~4x more.
    N, H, W, C = x.shape
    k, stride, pad = 3, 2, 1
    xp = jnp.pad(x, ((0, 0), (pad, pad), (pad, pad), (0, 0)),
                 constant_values=-jnp.inf)
    Ho = (H + 2 * pad - k) // stride + 1
    Wo = (W + 2 * pad - k) // stride + 1
    M = N * Ho * Wo
    f = _lane_fold(M, C)
    Mf, Cf = M // f, C * f

    wins = []
    for i in range(k):
        for j in range(k):
            w = jax.lax.slice(
                xp, (0, i, j, 0),
                (N, i + (Ho - 1) * stride + 1, j + (Wo - 1) * stride + 1, C),
                (1, stride, stride, 1))
            wins.append(w.reshape(Mf, Cf))

    Rp, TR, g = _row_grid(Mf)
    wins = [jnp.pad(w, ((0, Rp - Mf), (0, 0))) for w in wins]
    row_spec = pl.BlockSpec((TR, Cf), lambda i: (i, 0))
    out = pl.pallas_call(
        _max9_kernel,
        grid=(g,),
        in_specs=[row_spec] * 9,
        out_specs=row_spec,
        out_shape=jax.ShapeDtypeStruct((Rp, Cf), x.dtype),
        compiler_params=pltpu.CompilerParams(dimension_semantics=("parallel",),
                                             vmem_limit_bytes=VMEM_LIMIT),
    )(*wins)
    return out[:Mf].reshape(N, Ho, Wo, C)


# -------------------- parameters --------------------

def _kaiming(key, cout, cin, kh, kw):
    # kaiming_normal_(mode='fan_out', nonlinearity='relu')
    fan_out = cout * kh * kw
    std = np.sqrt(2.0 / fan_out)
    return jax.random.normal(key, (cout, cin, kh, kw), dtype=jnp.float32) * std


def _prep_conv(w):
    """Im2col weight matrix for the generic matmul path: (Kp, Np) bf16."""
    Cout, Cin, kh, kw = w.shape
    K = kh * kw * Cin
    wmat = jnp.transpose(w, (2, 3, 1, 0)).reshape(K, Cout)
    Kp = _pad_to(K, 128)
    Np = _pad_to(Cout, 128)
    wmat = jnp.pad(wmat, ((0, Kp - K), (0, Np - Cout))).astype(jnp.bfloat16)
    return {"kind": "im2col", "wmat": wmat, "K": K, "Cout": Cout, "kh": kh, "kw": kw}


def _prep_conv3(w):
    """3x3 stride-1 conv weights for the fused kernel: (9, Cin, Np) bf16."""
    Cout, Cin, kh, kw = w.shape
    Np = _pad_to(Cout, 128)
    wmat = jnp.transpose(w, (2, 3, 1, 0)).reshape(kh * kw, Cin, Cout)
    wmat = jnp.pad(wmat, ((0, 0), (0, 0), (0, Np - Cout))).astype(jnp.bfloat16)
    return {"kind": "fused3x3", "w": wmat, "Cout": Cout, "Cin": Cin}


def init_pose_encoder_params(key, num_input_images=1):
    keys = iter(jax.random.split(key, 64))

    params = {
        "conv1": _prep_conv(_kaiming(next(keys), 64, num_input_images * 3, 7, 7)),
        "bn1_g": jnp.ones((64,), jnp.float32),
        "bn1_b": jnp.zeros((64,), jnp.float32),
    }

    inplanes = 64
    layer_planes = [64, 128, 256, 512]
    layer_strides = [1, 2, 2, 2]
    layers = []
    for planes, stride in zip(layer_planes, layer_strides):
        blocks = []
        for bidx in range(2):  # resnet18: [2, 2, 2, 2]
            s = stride if bidx == 0 else 1
            prep1 = _prep_conv3 if s == 1 else _prep_conv
            blk = {
                "stride": s,
                "conv1": prep1(_kaiming(next(keys), planes, inplanes, 3, 3)),
                "bn1_g": jnp.ones((planes,), jnp.float32),
                "bn1_b": jnp.zeros((planes,), jnp.float32),
                "conv2": _prep_conv3(_kaiming(next(keys), planes, planes, 3, 3)),
                "bn2_g": jnp.ones((planes,), jnp.float32),
                "bn2_b": jnp.zeros((planes,), jnp.float32),
            }
            if s != 1 or inplanes != planes:
                blk["ds_conv"] = _prep_conv(_kaiming(next(keys), planes, inplanes, 1, 1))
                blk["ds_bn_g"] = jnp.ones((planes,), jnp.float32)
                blk["ds_bn_b"] = jnp.zeros((planes,), jnp.float32)
            blocks.append(blk)
            inplanes = planes
        layers.append(blocks)
    params["layers"] = layers
    return params


# -------------------- forward --------------------

def basic_block_forward(x, blk):
    out = conv_bn(x, blk["conv1"], blk["bn1_g"], blk["bn1_b"],
                  stride=blk["stride"], pad=1, relu=True)
    if "ds_conv" in blk:
        identity = conv_bn(x, blk["ds_conv"], blk["ds_bn_g"], blk["ds_bn_b"],
                           stride=blk["stride"], pad=0, relu=False)
    else:
        identity = x
    # relu(bn2(conv2(out)) + identity), fused in the BN-apply kernel
    return conv_bn(out, blk["conv2"], blk["bn2_g"], blk["bn2_b"],
                   stride=1, pad=1, relu=True, residual=identity)


def pose_encoder_forward(params, input_image_nchw):
    """input_image_nchw: (N, 3*num_input_images, H, W). Returns 5 NCHW feature maps."""
    x = jnp.transpose(input_image_nchw, (0, 2, 3, 1)).astype(jnp.float32)  # -> NHWC
    x = (x - 0.45) / 0.225   # explicit normalization (exact w.r.t. zero padding in conv1)
    f0 = conv_bn(x, params["conv1"], params["bn1_g"], params["bn1_b"],
                 stride=2, pad=3, relu=True)
    features = [f0]
    x = maxpool_3x3_s2(f0)
    for blocks in params["layers"]:
        for blk in blocks:
            x = basic_block_forward(x, blk)
        features.append(x)
    # back to NCHW, f32 (interface parity with the PyTorch module)
    return [jnp.transpose(f, (0, 3, 1, 2)).astype(jnp.float32) for f in features]


# -------------------- main --------------------

if __name__ == "__main__":
    key = jax.random.PRNGKey(0)
    pkey, xkey = jax.random.split(key)
    params = init_pose_encoder_params(pkey, num_input_images=1)

    # small shapes: batch=2, 3 channels, 32x32 spatial
    input_image = jax.random.uniform(xkey, (2, 3, 32, 32), dtype=jnp.float32)

    feats = pose_encoder_forward(params, input_image)
    feats = jax.block_until_ready(feats)

    expected_ch = [64, 64, 128, 256, 512]
    expected_hw = [16, 8, 4, 2, 1]
    for f, c, hw in zip(feats, expected_ch, expected_hw):
        assert f.shape == (2, c, hw, hw), f.shape
        assert bool(jnp.all(jnp.isfinite(f)))

    print("KERNEL_OK")
</pallas_src>

<mosaic_0001>
module attributes {stable_mosaic.version = 11 : i64} {
  func.func @_matmul_stats_kernel(%arg0: i32, %arg1: i32, %arg2: i32, %arg3: memref<512x256xbf16, #tpu.memory_space<vmem>>, %arg4: memref<256x128xbf16, #tpu.memory_space<vmem>>, %arg5: memref<512x128xbf16, #tpu.memory_space<vmem>>, %arg6: memref<1x1x128xf32, #tpu.memory_space<vmem>>, %arg7: memref<1x1x128xf32, #tpu.memory_space<vmem>>, %arg8: memref<512x128xf32, #tpu.memory_space<vmem>>) attributes {dimension_semantics = [#tpu.dimension_semantics<parallel>, #tpu.dimension_semantics<parallel>, #tpu.dimension_semantics<arbitrary>], iteration_bounds = array<i64: 1, 1, 1>, scalar_prefetch = 0 : i64, scratch_operands = 1 : i64, tpu.core_type = #tpu.core_type<tc>, window_params = [{transform_indices = @transform_0, window_bounds = array<i64: 512, 256>}, {transform_indices = @transform_1, window_bounds = array<i64: 256, 128>}, {transform_indices = @transform_2, window_bounds = array<i64: 512, 128>}, {transform_indices = @transform_3, window_bounds = array<i64: 1, 1, 128>}, {transform_indices = @transform_4, window_bounds = array<i64: 1, 1, 128>}]} {
    %c0 = arith.constant 0 : index
    %c0_0 = arith.constant 0 : index
    %0 = vector.load %arg3[%c0, %c0_0] : memref<512x256xbf16, #tpu.memory_space<vmem>>, vector<512x256xbf16>
    %c0_1 = arith.constant 0 : index
    %c0_2 = arith.constant 0 : index
    %1 = vector.load %arg4[%c0_1, %c0_2] : memref<256x128xbf16, #tpu.memory_space<vmem>>, vector<256x128xbf16>
    %cst = arith.constant dense<0.000000e+00> : vector<512x128xf32>
    %2 = tpu.matmul %0, %1, %cst {dimension_numbers = #tpu.dot_dimension_numbers<[1], [0], [0], [1], [0, 0, 1, 1], [], []>} : vector<512x256xbf16>, vector<256x128xbf16>, vector<512x128xf32> -> vector<512x128xf32>
    %c0_i32 = arith.constant 0 : i32
    %3 = arith.cmpi eq, %arg2, %c0_i32 : i32
    %4 = arith.extui %3 : i1 to i32
    %c0_i32_3 = arith.constant 0 : i32
    %5 = arith.cmpi ne, %4, %c0_i32_3 : i32
    scf.if %5 {
      %c0_8 = arith.constant 0 : index
      %c0_9 = arith.constant 0 : index
      %12 = vector.load %arg8[%c0_8, %c0_9] : memref<512x128xf32, #tpu.memory_space<vmem>>, vector<512x128xf32>
      tpu.vector_store %arg8[%c0_8, %c0_9], %2 {strides = array<i32>} : memref<512x128xf32, #tpu.memory_space<vmem>>, vector<512x128xf32>,
    } else {
    }
    %c0_i32_4 = arith.constant 0 : i32
    %6 = arith.cmpi sgt, %arg2, %c0_i32_4 : i32
    %7 = arith.extui %6 : i1 to i32
    %c0_i32_5 = arith.constant 0 : i32
    %8 = arith.cmpi ne, %7, %c0_i32_5 : i32
    scf.if %8 {
      %c0_8 = arith.constant 0 : index
      %c0_9 = arith.constant 0 : index
      %12 = vector.load %arg8[%c0_8, %c0_9] : memref<512x128xf32, #tpu.memory_space<vmem>>, vector<512x128xf32>
      %13 = arith.addf %12, %2 : vector<512x128xf32>
      %c0_10 = arith.constant 0 : index
      %c0_11 = arith.constant 0 : index
      %14 = vector.load %arg8[%c0_10, %c0_11] : memref<512x128xf32, #tpu.memory_space<vmem>>, vector<512x128xf32>
      tpu.vector_store %arg8[%c0_10, %c0_11], %13 {strides = array<i32>} : memref<512x128xf32, #tpu.memory_space<vmem>>, vector<512x128xf32>,
    } else {
    }
    %c0_i32_6 = arith.constant 0 : i32
    %9 = arith.cmpi eq, %arg2, %c0_i32_6 : i32
    %10 = arith.extui %9 : i1 to i32
    %c0_i32_7 = arith.constant 0 : i32
    %11 = arith.cmpi ne, %10, %c0_i32_7 : i32
    scf.if %11 {
      %c0_8 = arith.constant 0 : index
      %c0_9 = arith.constant 0 : index
      %12 = vector.load %arg8[%c0_8, %c0_9] : memref<512x128xf32, #tpu.memory_space<vmem>>, vector<512x128xf32>
      %13 = arith.truncf %12 : vector<512x128xf32> to vector<512x128xbf16>
      %c0_10 = arith.constant 0 : index
      %c0_11 = arith.constant 0 : index
      %14 = vector.load %arg5[%c0_10, %c0_11] : memref<512x128xbf16, #tpu.memory_space<vmem>>, vector<512x128xbf16>
      tpu.vector_store %arg5[%c0_10, %c0_11], %13 {strides = array<i32>} : memref<512x128xbf16, #tpu.memory_space<vmem>>, vector<512x128xbf16>,
      %cst_12 = arith.constant dense<0.000000e+00> : vector<128xf32>
      %15 = vector.multi_reduction <add>, %12, %cst_12 [0] : vector<512x128xf32> to vector<128xf32>
      %16 = vector.shape_cast %15 : vector<128xf32> to vector<1x1x128xf32>
      %c0_13 = arith.constant 0 : index
      %c0_14 = arith.constant 0 : index
      %c0_15 = arith.constant 0 : index
      %17 = vector.load %arg6[%c0_13, %c0_14, %c0_15] : memref<1x1x128xf32, #tpu.memory_space<vmem>>, vector<1x1x128xf32>
      tpu.vector_store %arg6[%c0_13, %c0_14, %c0_15], %16 {strides = array<i32>} : memref<1x1x128xf32, #tpu.memory_space<vmem>>, vector<1x1x128xf32>,
      %18 = arith.mulf %12, %12 : vector<512x128xf32>
      %cst_16 = arith.constant dense<0.000000e+00> : vector<128xf32>
      %19 = vector.multi_reduction <add>, %18, %cst_16 [0] : vector<512x128xf32> to vector<128xf32>
      %20 = vector.shape_cast %19 : vector<128xf32> to vector<1x1x128xf32>
      %c0_17 = arith.constant 0 : index
      %c0_18 = arith.constant 0 : index
      %c0_19 = arith.constant 0 : index
      %21 = vector.load %arg7[%c0_17, %c0_18, %c0_19] : memref<1x1x128xf32, #tpu.memory_space<vmem>>, vector<1x1x128xf32>
      tpu.vector_store %arg7[%c0_17, %c0_18, %c0_19], %20 {strides = array<i32>} : memref<1x1x128xf32, #tpu.memory_space<vmem>>, vector<1x1x128xf32>,
    } else {
    }
    return
  }
  func.func @transform_0(%arg0: i32, %arg1: i32, %arg2: i32) -> (i32, i32) {
    %c0_i32 = arith.constant 0 : i32
    return %arg0, %arg2 : i32, i32
  }
  func.func @transform_1(%arg0: i32, %arg1: i32, %arg2: i32) -> (i32, i32) {
    %c0_i32 = arith.constant 0 : i32
    return %arg2, %arg1 : i32, i32
  }
  func.func @transform_2(%arg0: i32, %arg1: i32, %arg2: i32) -> (i32, i32) {
    %c0_i32 = arith.constant 0 : i32
    return %arg0, %arg1 : i32, i32
  }
  func.func @transform_3(%arg0: i32, %arg1: i32, %arg2: i32) -> (i32, i32, i32) {
    %c0_i32 = arith.constant 0 : i32
    %c0_i32_0 = arith.constant 0 : i32
    return %arg0, %c0_i32, %arg1 : i32, i32, i32
  }
  func.func @transform_4(%arg0: i32, %arg1: i32, %arg2: i32) -> (i32, i32, i32) {
    %c0_i32 = arith.constant 0 : i32
    %c0_i32_0 = arith.constant 0 : i32
    return %arg0, %c0_i32, %arg1 : i32, i32, i32
  }
}

</mosaic_0001>

<bundles_post_ra>
// kernel: tpu_custom_call.1
= control target key start
LH: loop header
LB: loop body
LE: loop exit
PB: predicated region body
PF: predicated region fallthrough
CT: control target
= control target key end

     0   :  { %10 = vsyncpa [#allocation4], 0  ;;  %s2819_s0 = inlined_call_operand.hbm [shape: bf16[512,256], index: 0, kind: input, shape index: {}]   ;;  %s2820_s1 = inlined_call_operand.hbm [shape: bf16[256,128], index: 1, kind: input, shape index: {}]   ;;  %s2821_s2 = inlined_call_operand.hbm [shape: bf16[512,128], index: 2, kind: output, shape index: {0}]   ;;  %s2822_s3 = inlined_call_operand.hbm [shape: f32[1,1,128], index: 3, kind: output, shape index: {1}]   ;;  %s2823_s4 = inlined_call_operand.hbm [shape: f32[1,1,128], index: 4, kind: output, shape index: {2}]  }
   0x1   :  { %11 = vsyncpa [#allocation7], 0 }
   0x2   :  { %12 = vsyncpa [#allocation5], 0 }
   0x3   :  { %13 = vsyncpa [#allocation10], 0  ;;  %s2407_s15 = smov [#allocation3]  }
   0x4   :  { %s19_s16 = sshll.u32 %s2407_s15, 4  ;;  %s20_s16 = int_to_ptr.vmem [resolvable:$true] %s19_s16 }
   0x5   :  { %s2307_s17 = scalar_lea.vmem %s20_s16, 8192  ;;  %p2312_p1 = scmp.lt.s32.totalorder %s20_s16, %s20_s16 }
   0x6   :  { %p2308_p0 = scmp.ne.s32.totalorder %s20_s16, %s2307_s17  ;;  %p2313_p2 = scmp.lt.s32.totalorder %s2307_s17, %s2307_s17 }
   0x8   :  { %p2314_p3 = por %p2313_p2, %p2312_p1 }
   0xa   :  { %p2315_p4 = pnand %p2314_p3, %p2308_p0 }
   0xc   :  { %2318 = shalt.err (!%p2315_p4)
}
   0xd   :  { %s2408_s18 = smov 128   ;;  %s2409_s19 = smov 8  }
   0xe   :  { %25 = dma.hbm_to_vmem [thread:$0]  %s2819_s0, 8192, %s20_s16, [#allocation4], %s2408_s18, %s2408_s18, %s2409_s19  }
   0xf   :  { %s2410_s22 = smov [#allocation6]  }
  0x10   :  { %s31_s23 = sshll.u32 %s2410_s22, 4  ;;  %s32_s23 = int_to_ptr.vmem [resolvable:$true] %s31_s23 }
  0x11   :  { %s2327_s24 = scalar_lea.vmem %s32_s23, 2048  ;;  %p2332_p6 = scmp.lt.s32.totalorder %s32_s23, %s32_s23 }
  0x12   :  { %p2328_p5 = scmp.ne.s32.totalorder %s32_s23, %s2327_s24  ;;  %p2333_p7 = scmp.lt.s32.totalorder %s2327_s24, %s2327_s24 }
  0x14   :  { %p2334_p8 = por %p2333_p7, %p2332_p6 }
  0x16   :  { %p2335_p9 = pnand %p2334_p8, %p2328_p5 }
  0x18   :  { %2338 = shalt.err (!%p2335_p9)
}
  0x19   :  { %s2411_s25 = smov 64   ;;  %s2412_s26 = smov 4  }
  0x1a   :  { %37 = dma.hbm_to_vmem [thread:$0]  %s2820_s1, 2048, %s32_s23, [#allocation7], %s2411_s25, %s2411_s25, %s2412_s26  }
  0x1b   :  { %2399 = dma.done.wait [#allocation4], 8192  }
  0x1c   :  { %2400 = vsyncadd [#allocation4], 4294959104 }
  0x1d   :  { %2401 = dma.done.wait [#allocation7], 2048  }
  0x1e   :  { %2402 = vsyncadd [#allocation7], 4294965248  ;;  %v2413_v0 = vmov 0   ;;  %v2187_v1 = vld [vmem:[#allocation6 + $0x38] sm:$0xff]   ;;  %v2188_v2 = vld [vmem:[#allocation6 + $0x30] sm:$0xff]   ;;  %s2414_s0 = smov [#allocation8]  }
  0x1f   :  { %557 = vmatprep.subr.bf16.mxu0 %v2413_v0  ;;  %2145 = vmatprep.subr.bf16.mxu1 %v2413_v0  ;;  %v2189_v3 = vld [vmem:[#allocation6 + $0x28] sm:$0xff]   ;;  %v2190_v4 = vld [vmem:[#allocation6 + $0x20] sm:$0xff]   ;;  %v2191_v5 = vld [vmem:[#allocation6 + $0x18] sm:$0xff]   ;;  %s1706_s1 = sshll.u32 %s2414_s0, 4  ;;  %s1707_s1 = int_to_ptr.vmem [resolvable:$true] %s1706_s1 }
  0x20   :  { %558 = vmatpush1.bf16.msra.mxu0 %v2187_v1  ;;  %2161 = vmatpush1.bf16.msra.mxu1 %v2187_v1  ;;  %v2205_v6 = vld [vmem:[#allocation3 + $0x4] ss:$8 sps:$4 sm:$0xff]   ;;  %v2192_v7 = vld [vmem:[#allocation6 + $0x10] sm:$0xff]   ;;  %v2195_v11 = vld [vmem:[#allocation6 + $0x78] sm:$0xff]   ;;  %s2339_s29 = scalar_lea.vmem %s1707_s1, 4096  ;;  %p2344_p11 = scmp.lt.s32.totalorder %s1707_s1, %s1707_s1 }
  0x21   :  { %559 = vmatprep.subr.bf16.mxu0 %v2413_v0  ;;  %2146 = vmatprep.subr.bf16.mxu1 %v2413_v0  ;;  %v2193_v8 = vld [vmem:[#allocation6 + $0x8] sm:$0xff]   ;;  %v2194_v9 = vld [vmem:[#allocation6] sm:$0xff]   ;;  %v2196_v12 = vld [vmem:[#allocation6 + $0x70] sm:$0xff]   ;;  %p2340_p10 = scmp.ne.s32.totalorder %s1707_s1, %s2339_s29  ;;  %p2345_p12 = scmp.lt.s32.totalorder %s2339_s29, %s2339_s29 }
  0x22   :  { %589 = vmatprep.mubr.bf16.mxu0 %v2205_v6  ;;  %v2229_v10 = vld [vmem:[#allocation3 + $0x104] ss:$8 sps:$4 sm:$0xff]   ;;  %v2199_v15 = vld [vmem:[#allocation6 + $0x58] sm:$0xff]   ;;  %v2200_v16 = vld [vmem:[#allocation6 + $0x50] sm:$0xff]  }
  0x23   :  { %717 = vmatprep.mubr.bf16.mxu1 %v2229_v10  ;;  %v2197_v13 = vld [vmem:[#allocation6 + $0x68] sm:$0xff]   ;;  %v2198_v14 = vld [vmem:[#allocation6 + $0x60] sm:$0xff]   ;;  %v2206_v21 = vld [vmem:[#allocation3 + $0x14] ss:$8 sps:$4 sm:$0xff]   ;;  %p2346_p13 = por %p2345_p12, %p2344_p11 }
  0x24   :  { %560 = vmatpush1.bf16.msra.mxu0 %v2188_v2  ;;  %2162 = vmatpush1.bf16.msra.mxu1 %v2188_v2  ;;  %v2201_v17 = vld [vmem:[#allocation6 + $0x48] sm:$0xff]   ;;  %v2202_v18 = vld [vmem:[#allocation6 + $0x40] sm:$0xff]   ;;  %v2233_v22 = vld [vmem:[#allocation3 + $0x114] ss:$8 sps:$4 sm:$0xff]  }
  0x25   :  { %561 = vmatprep.subr.bf16.mxu0 %v2413_v0  ;;  %2147 = vmatprep.subr.bf16.mxu1 %v2413_v0  ;;  %v2203_v19 = vld [vmem:[#allocation3] ss:$8 sps:$4 sm:$0xff]   ;;  %v2208_v23 = vld [vmem:[#allocation3 + $0x10] ss:$8 sps:$4 sm:$0xff]   ;;  %v2209_v25 = vld [vmem:[#allocation3 + $0x24] ss:$8 sps:$4 sm:$0xff]   ;;  %p2347_p0 = pnand %p2346_p13, %p2340_p10 }
  0x26   :  { %v2227_v20 = vld [vmem:[#allocation3 + $0x100] ss:$8 sps:$4 sm:$0xff]   ;;  %v2235_v24 = vld [vmem:[#allocation3 + $0x110] ss:$8 sps:$4 sm:$0xff]   ;;  %v2239_v26 = vld [vmem:[#allocation3 + $0x124] ss:$8 sps:$4 sm:$0xff]  }
  0x27   :  { %v2211_v27 = vld [vmem:[#allocation3 + $0x20] ss:$8 sps:$4 sm:$0xff]   ;;  %v2212_v29 = vld [vmem:[#allocation3 + $0x34] ss:$8 sps:$4 sm:$0xff]   ;;  %v2214_v31 = vld [vmem:[#allocation3 + $0x30] ss:$8 sps:$4 sm:$0xff]  }
  0x28   :  { %562 = vmatpush1.bf16.msra.mxu0 %v2189_v3  ;;  %2163 = vmatpush1.bf16.msra.mxu1 %v2189_v3  ;;  %v2241_v28 = vld [vmem:[#allocation3 + $0x120] ss:$8 sps:$4 sm:$0xff]   ;;  %v2245_v30 = vld [vmem:[#allocation3 + $0x134] ss:$8 sps:$4 sm:$0xff]   ;;  %v2247_v32 = vld [vmem:[#allocation3 + $0x130] ss:$8 sps:$4 sm:$0xff]  }
  0x29   :  { %563 = vmatprep.subr.bf16.mxu0 %v2413_v0  ;;  %2148 = vmatprep.subr.bf16.mxu1 %v2413_v0  ;;  %v2215_v33 = vld [vmem:[#allocation3 + $0x44] ss:$8 sps:$4 sm:$0xff]   ;;  %v2217_v35 = vld [vmem:[#allocation3 + $0x40] ss:$8 sps:$4 sm:$0xff]   ;;  %v2218_v37 = vld [vmem:[#allocation3 + $0x54] ss:$8 sps:$4 sm:$0xff]  }
  0x2a   :  { %v2251_v34 = vld [vmem:[#allocation3 + $0x144] ss:$8 sps:$4 sm:$0xff]   ;;  %v2253_v36 = vld [vmem:[#allocation3 + $0x140] ss:$8 sps:$4 sm:$0xff]   ;;  %v2257_v38 = vld [vmem:[#allocation3 + $0x154] ss:$8 sps:$4 sm:$0xff]  }
  0x2b   :  { %v2220_v39 = vld [vmem:[#allocation3 + $0x50] ss:$8 sps:$4 sm:$0xff]   ;;  %v2221_v41 = vld [vmem:[#allocation3 + $0x64] ss:$8 sps:$4 sm:$0xff]   ;;  %v2223_v43 = vld [vmem:[#allocation3 + $0x60] ss:$8 sps:$4 sm:$0xff]  }
  0x2c   :  { %564 = vmatpush1.bf16.msra.mxu0 %v2190_v4  ;;  %2164 = vmatpush1.bf16.msra.mxu1 %v2190_v4  ;;  %v2259_v40 = vld [vmem:[#allocation3 + $0x150] ss:$8 sps:$4 sm:$0xff]   ;;  %v2263_v42 = vld [vmem:[#allocation3 + $0x164] ss:$8 sps:$4 sm:$0xff]   ;;  %v2265_v44 = vld [vmem:[#allocation3 + $0x160] ss:$8 sps:$4 sm:$0xff]  }
  0x2d   :  { %565 = vmatprep.subr.bf16.mxu0 %v2413_v0  ;;  %2149 = vmatprep.subr.bf16.mxu1 %v2413_v0  ;;  %v2224_v45 = vld [vmem:[#allocation3 + $0x74] ss:$8 sps:$4 sm:$0xff]   ;;  %v2226_v47 = vld [vmem:[#allocation3 + $0x70] ss:$8 sps:$4 sm:$0xff]   ;;  %v2230_v49 = vld [vmem:[#allocation3 + $0x84] ss:$8 sps:$4 sm:$0xff]  }
  0x2e   :  { %v2269_v46 = vld [vmem:[#allocation3 + $0x174] ss:$8 sps:$4 sm:$0xff]   ;;  %v2271_v48 = vld [vmem:[#allocation3 + $0x170] ss:$8 sps:$4 sm:$0xff]   ;;  %v2275_v50 = vld [vmem:[#allocation3 + $0x184] ss:$8 sps:$4 sm:$0xff]  }
  0x2f   :  { %v2232_v51 = vld [vmem:[#allocation3 + $0x80] ss:$8 sps:$4 sm:$0xff]   ;;  %v2236_v53 = vld [vmem:[#allocation3 + $0x94] ss:$8 sps:$4 sm:$0xff]   ;;  %v2238_v55 = vld [vmem:[#allocation3 + $0x90] ss:$8 sps:$4 sm:$0xff]  }
  0x30   :  { %566 = vmatpush1.bf16.msra.mxu0 %v2191_v5  ;;  %2165 = vmatpush1.bf16.msra.mxu1 %v2191_v5  ;;  %v2277_v52 = vld [vmem:[#allocation3 + $0x180] ss:$8 sps:$4 sm:$0xff]   ;;  %v2278_v54 = vld [vmem:[#allocation3 + $0x194] ss:$8 sps:$4 sm:$0xff]   ;;  %v2280_v56 = vld [vmem:[#allocation3 + $0x190] ss:$8 sps:$4 sm:$0xff]  }
  0x31   :  { %567 = vmatprep.subr.bf16.mxu0 %v2413_v0  ;;  %2150 = vmatprep.subr.bf16.mxu1 %v2413_v0  ;;  %v2242_v57 = vld [vmem:[#allocation3 + $0xa4] ss:$8 sps:$4 sm:$0xff]   ;;  %v2244_v59 = vld [vmem:[#allocation3 + $0xa0] ss:$8 sps:$4 sm:$0xff]   ;;  %v2248_v61 = vld [vmem:[#allocation3 + $0xb4] ss:$8 sps:$4 sm:$0xff]  }
  0x32   :  { %v2281_v58 = vld [vmem:[#allocation3 + $0x1a4] ss:$8 sps:$4 sm:$0xff]   ;;  %v2283_v60 = vld [vmem:[#allocation3 + $0x1a0] ss:$8 sps:$4 sm:$0xff]   ;;  %v2284_v62 = vld [vmem:[#allocation3 + $0x1b4] ss:$8 sps:$4 sm:$0xff]  }
  0x33   :  { %v2250_v63 = vld [vmem:[#allocation3 + $0xb0] ss:$8 sps:$4 sm:$0xff]   ;;  %v2254_v1 = vld [vmem:[#allocation3 + $0xc4] ss:$8 sps:$4 sm:$0xff]   ;;  %v2256_v3 = vld [vmem:[#allocation3 + $0xc0] ss:$8 sps:$4 sm:$0xff]  }
  0x34   :  { %568 = vmatpush1.bf16.msra.mxu0 %v2192_v7  ;;  %2166 = vmatpush1.bf16.msra.mxu1 %v2192_v7  ;;  %v2287_v2 = vld [vmem:[#allocation3 + $0x1c4] ss:$8 sps:$4 sm:$0xff]   ;;  %v2289_v4 = vld [vmem:[#allocation3 + $0x1c0] ss:$8 sps:$4 sm:$0xff]   ;;  %v2260_v5 = vld [vmem:[#allocation3 + $0xd4] ss:$8 sps:$4 sm:$0xff]  }
  0x35   :  { %569 = vmatprep.subr.bf16.mxu0 %v2413_v0  ;;  %2151 = vmatprep.subr.bf16.mxu1 %v2413_v0  ;;  %v2290_v6 = vld [vmem:[#allocation3 + $0x1d4] ss:$8 sps:$4 sm:$0xff]   ;;  %v2262_v7 = vld [vmem:[#allocation3 + $0xd0] ss:$8 sps:$4 sm:$0xff]   ;;  %v2293_v10 = vld [vmem:[#allocation3 + $0x1e4] ss:$8 sps:$4 sm:$0xff]  }
  0x38   :  { %570 = vmatpush1.bf16.msra.mxu0 %v2193_v8  ;;  %2167 = vmatpush1.bf16.msra.mxu1 %v2193_v8  ;;  %v2292_v8 = vld [vmem:[#allocation3 + $0x1d0] ss:$8 sps:$4 sm:$0xff]  }
  0x39   :  { %571 = vmatprep.subr.bf16.mxu0 %v2413_v0  ;;  %2152 = vmatprep.subr.bf16.mxu1 %v2413_v0 }
  0x3c   :  { %572 = vmatpush1.bf16.msra.mxu0 %v2194_v9  ;;  %2168 = vmatpush1.bf16.msra.mxu1 %v2194_v9  ;;  %v2266_v9 = vld [vmem:[#allocation3 + $0xe4] ss:$8 sps:$4 sm:$0xff]  }
  0x3d   :  { %573 = vmatprep.subr.bf16.mxu0 %v2413_v0  ;;  %2153 = vmatprep.subr.bf16.mxu1 %v2413_v0 }
  0x40   :  { %574 = vmatpush2.bf16.msra.mxu0 %v2195_v11  ;;  %2169 = vmatpush2.bf16.msra.mxu1 %v2195_v11  ;;  %v2268_v11 = vld [vmem:[#allocation3 + $0xe0] ss:$8 sps:$4 sm:$0xff]  }
  0x41   :  { %575 = vmatprep.subr.bf16.mxu0 %v2413_v0  ;;  %2154 = vmatprep.subr.bf16.mxu1 %v2413_v0 }
  0x44   :  { %576 = vmatpush2.bf16.msra.mxu0 %v2196_v12  ;;  %2170 = vmatpush2.bf16.msra.mxu1 %v2196_v12  ;;  %v2295_v12 = vld [vmem:[#allocation3 + $0x1e0] ss:$8 sps:$4 sm:$0xff]  }
  0x45   :  { %577 = vmatprep.subr.bf16.mxu0 %v2413_v0  ;;  %2155 = vmatprep.subr.bf16.mxu1 %v2413_v0 }
  0x48   :  { %578 = vmatpush2.bf16.msra.mxu0 %v2197_v13  ;;  %2171 = vmatpush2.bf16.msra.mxu1 %v2197_v13  ;;  %v2272_v13 = vld [vmem:[#allocation3 + $0xf4] ss:$8 sps:$4 sm:$0xff]  }
  0x49   :  { %579 = vmatprep.subr.bf16.mxu0 %v2413_v0  ;;  %2156 = vmatprep.subr.bf16.mxu1 %v2413_v0 }
  0x4c   :  { %580 = vmatpush2.bf16.msra.mxu0 %v2198_v14  ;;  %2172 = vmatpush2.bf16.msra.mxu1 %v2198_v14  ;;  %v2296_v14 = vld [vmem:[#allocation3 + $0x1f4] ss:$8 sps:$4 sm:$0xff]  }
  0x4d   :  { %581 = vmatprep.subr.bf16.mxu0 %v2413_v0  ;;  %2157 = vmatprep.subr.bf16.mxu1 %v2413_v0 }
  0x50   :  { %582 = vmatpush2.bf16.msra.mxu0 %v2199_v15  ;;  %2173 = vmatpush2.bf16.msra.mxu1 %v2199_v15  ;;  %v2274_v15 = vld [vmem:[#allocation3 + $0xf0] ss:$8 sps:$4 sm:$0xff]  }
  0x51   :  { %583 = vmatprep.subr.bf16.mxu0 %v2413_v0  ;;  %2158 = vmatprep.subr.bf16.mxu1 %v2413_v0 }
  0x54   :  { %584 = vmatpush2.bf16.msra.mxu0 %v2200_v16  ;;  %2174 = vmatpush2.bf16.msra.mxu1 %v2200_v16  ;;  %v2298_v16 = vld [vmem:[#allocation3 + $0x1f0] ss:$8 sps:$4 sm:$0xff]  }
  0x55   :  { %585 = vmatprep.subr.bf16.mxu0 %v2413_v0  ;;  %2159 = vmatprep.subr.bf16.mxu1 %v2413_v0 }
  0x58   :  { %586 = vmatpush2.bf16.msra.mxu0 %v2201_v17  ;;  %2175 = vmatpush2.bf16.msra.mxu1 %v2201_v17 }
  0x59   :  { %587 = vmatprep.subr.bf16.mxu0 %v2413_v0  ;;  %2160 = vmatprep.subr.bf16.mxu1 %v2413_v0  ;;  %v2286_v0 = vld [vmem:[#allocation3 + $0x1b0] ss:$8 sps:$4 sm:$0xff]  }
  0x5c   :  { %588 = vmatpush2.bf16.msra.mxu0 %v2202_v18  ;;  %2176 = vmatpush2.bf16.msra.mxu1 %v2202_v18 }
  0x5f   :  { %590 = vmatmul.mubr.bf16.vlgmr.msra.gmra.mxu0 %v2203_v19  ;;  %718 = vmatmul.mubr.bf16.vlgmr.msra.gmra.mxu1 %v2227_v20 }
  0x60   :  { %597 = vmatprep.mubr.bf16.mxu0 %v2206_v21  ;;  %725 = vmatprep.mubr.bf16.mxu1 %v2233_v22 }
  0x67   :  { %598 = vmatmul.mubr.bf16.gmra.mxu0 %v2208_v23  ;;  %726 = vmatmul.mubr.bf16.gmra.mxu1 %v2235_v24 }
  0x68   :  { %605 = vmatprep.mubr.bf16.mxu0 %v2209_v25  ;;  %733 = vmatprep.mubr.bf16.mxu1 %v2239_v26 }
  0x6f   :  { %606 = vmatmul.mubr.bf16.gmra.mxu0 %v2211_v27  ;;  %734 = vmatmul.mubr.bf16.gmra.mxu1 %v2241_v28 }
  0x70   :  { %613 = vmatprep.mubr.bf16.mxu0 %v2212_v29  ;;  %741 = vmatprep.mubr.bf16.mxu1 %v2245_v30 }
  0x77   :  { %614 = vmatmul.mubr.bf16.gmra.mxu0 %v2214_v31  ;;  %742 = vmatmul.mubr.bf16.gmra.mxu1 %v2247_v32 }
  0x78   :  { %621 = vmatprep.mubr.bf16.mxu0 %v2215_v33  ;;  %749 = vmatprep.mubr.bf16.mxu1 %v2251_v34 }
  0x7f   :  { %622 = vmatmul.mubr.bf16.gmra.mxu0 %v2217_v35  ;;  %750 = vmatmul.mubr.bf16.gmra.mxu1 %v2253_v36 }
  0x80   :  { %629 = vmatprep.mubr.bf16.mxu0 %v2218_v37  ;;  %757 = vmatprep.mubr.bf16.mxu1 %v2257_v38 }
  0x87   :  { %630 = vmatmul.mubr.bf16.gmra.mxu0 %v2220_v39  ;;  %758 = vmatmul.mubr.bf16.gmra.mxu1 %v2259_v40 }
  0x88   :  { %637 = vmatprep.mubr.bf16.mxu0 %v2221_v41  ;;  %765 = vmatprep.mubr.bf16.mxu1 %v2263_v42 }
  0x8f   :  { %638 = vmatmul.mubr.bf16.gmra.mxu0 %v2223_v43  ;;  %766 = vmatmul.mubr.bf16.gmra.mxu1 %v2265_v44 }
  0x90   :  { %645 = vmatprep.mubr.bf16.mxu0 %v2224_v45  ;;  %773 = vmatprep.mubr.bf16.mxu1 %v2269_v46 }
  0x97   :  { %646 = vmatmul.mubr.bf16.gmra.mxu0 %v2226_v47  ;;  %774 = vmatmul.mubr.bf16.gmra.mxu1 %v2271_v48 }
  0x98   :  { %653 = vmatprep.mubr.bf16.mxu0 %v2230_v49  ;;  %781 = vmatprep.mubr.bf16.mxu1 %v2275_v50 }
  0x9f   :  { %654 = vmatmul.mubr.bf16.gmra.mxu0 %v2232_v51  ;;  %782 = vmatmul.mubr.bf16.gmra.mxu1 %v2277_v52 }
  0xa0   :  { %661 = vmatprep.mubr.bf16.mxu0 %v2236_v53  ;;  %789 = vmatprep.mubr.bf16.mxu1 %v2278_v54 }
  0xa7   :  { %662 = vmatmul.mubr.bf16.gmra.mxu0 %v2238_v55  ;;  %790 = vmatmul.mubr.bf16.gmra.mxu1 %v2280_v56 }
  0xa8   :  { %669 = vmatprep.mubr.bf16.mxu0 %v2242_v57  ;;  %797 = vmatprep.mubr.bf16.mxu1 %v2281_v58 }
  0xaf   :  { %670 = vmatmul.mubr.bf16.gmra.mxu0 %v2244_v59  ;;  %798 = vmatmul.mubr.bf16.gmra.mxu1 %v2283_v60 }
  0xb0   :  { %677 = vmatprep.mubr.bf16.mxu0 %v2248_v61  ;;  %805 = vmatprep.mubr.bf16.mxu1 %v2284_v62 }
  0xb7   :  { %678 = vmatmul.mubr.bf16.gmra.mxu0 %v2250_v63  ;;  %806 = vmatmul.mubr.bf16.gmra.mxu1 %v2286_v0 }
  0xb8   :  { %685 = vmatprep.mubr.bf16.mxu0 %v2254_v1  ;;  %813 = vmatprep.mubr.bf16.mxu1 %v2287_v2 }
  0xbf   :  { %686 = vmatmul.mubr.bf16.gmra.mxu0 %v2256_v3  ;;  %814 = vmatmul.mubr.bf16.gmra.mxu1 %v2289_v4 }
  0xc0   :  { %693 = vmatprep.mubr.bf16.mxu0 %v2260_v5  ;;  %821 = vmatprep.mubr.bf16.mxu1 %v2290_v6 }
  0xc7   :  { %694 = vmatmul.mubr.bf16.gmra.mxu0 %v2262_v7  ;;  %822 = vmatmul.mubr.bf16.gmra.mxu1 %v2292_v8 }
  0xc8   :  { %701 = vmatprep.mubr.bf16.mxu0 %v2266_v9  ;;  %829 = vmatprep.mubr.bf16.mxu1 %v2293_v10 }
  0xcf   :  { %702 = vmatmul.mubr.bf16.gmra.mxu0 %v2268_v11  ;;  %830 = vmatmul.mubr.bf16.gmra.mxu1 %v2295_v12 }
  0xd0   :  { %709 = vmatprep.mubr.bf16.mxu0 %v2272_v13  ;;  %837 = vmatprep.mubr.bf16.mxu1 %v2296_v14 }
  0xd7   :  { %710 = vmatmul.mubr.bf16.gmra.mxu0 %v2274_v15  ;;  %838 = vmatmul.mubr.bf16.gmra.mxu1 %v2298_v16 }
 0x11f   :  { %v2483_v17 = vpop.f32.mrf.mxu0  ;;  %v2485_v18 = vpop.f32.mrf.mxu1 }
 0x121   :  { %v593_v19 = vpop.f32.mrf.mxu0  ;;  %v721_v20 = vpop.f32.mrf.mxu1 }
 0x123   :  { %v2487_v21 = vpop.f32.mrf.mxu0  ;;  %v2489_v22 = vpop.f32.mrf.mxu1 }
 0x124   :  { %v1957_v23 = vpack.c.bf16 %v2487_v21, %v2483_v17  ;;  %v2037_v24 = vpack.c.bf16 %v2489_v22, %v2485_v18 }
 0x125   :  { %v596_v25 = vpop.f32.mrf.mxu0  ;;  %v724_v26 = vpop.f32.mrf.mxu1 }
 0x126   :  { %1958 = vst [vmem:[#allocation8] sm:$0xff] %v1957_v23   ;;  %2129 = vst [vmem:[#allocation8 + $0x80] sm:$0xff] %v2037_v24  }
 0x127   :  { %v2495_v27 = vpop.f32.mrf.mxu0  ;;  %v2497_v28 = vpop.f32.mrf.mxu1 }
 0x129   :  { %v601_v29 = vpop.f32.mrf.mxu0  ;;  %v729_v30 = vpop.f32.mrf.mxu1 }
 0x12b   :  { %v2499_v31 = vpop.f32.mrf.mxu0  ;;  %v2501_v32 = vpop.f32.mrf.mxu1 }
 0x12c   :  { %v1962_v33 = vpack.c.bf16 %v2499_v31, %v2495_v27  ;;  %v2042_v34 = vpack.c.bf16 %v2501_v32, %v2497_v28 }
 0x12d   :  { %v604_v35 = vpop.f32.mrf.mxu0  ;;  %v732_v36 = vpop.f32.mrf.mxu1 }
 0x12e   :  { %2114 = vst [vmem:[#allocation8 + $0x8] sm:$0xff] %v1962_v33   ;;  %2130 = vst [vmem:[#allocation8 + $0x88] sm:$0xff] %v2042_v34  }
 0x12f   :  { %v2507_v37 = vpop.f32.mrf.mxu0  ;;  %v2509_v38 = vpop.f32.mrf.mxu1 }
 0x131   :  { %v609_v39 = vpop.f32.mrf.mxu0  ;;  %v737_v40 = vpop.f32.mrf.mxu1 }
 0x133   :  { %v2511_v41 = vpop.f32.mrf.mxu0  ;;  %v2513_v42 = vpop.f32.mrf.mxu1 }
 0x134   :  { %v1967_v43 = vpack.c.bf16 %v2511_v41, %v2507_v37  ;;  %v2047_v44 = vpack.c.bf16 %v2513_v42, %v2509_v38 }
 0x135   :  { %v612_v45 = vpop.f32.mrf.mxu0  ;;  %v740_v46 = vpop.f32.mrf.mxu1 }
 0x136   :  { %2115 = vst [vmem:[#allocation8 + $0x10] sm:$0xff] %v1967_v43   ;;  %2131 = vst [vmem:[#allocation8 + $0x90] sm:$0xff] %v2047_v44   ;;  %v1568_v43 = vmul.f32 %v2487_v21, %v2487_v21  ;;  %v1567_v46 = vmul.f32 %v2483_v17, %v2483_v17 }
 0x137   :  { %v2519_v47 = vpop.f32.mrf.mxu0  ;;  %v2521_v48 = vpop.f32.mrf.mxu1 }
 0x139   :  { %v617_v49 = vpop.f32.mrf.mxu0  ;;  %v745_v50 = vpop.f32.mrf.mxu1 }
 0x13a   :  { %v1569_v49 = vmul.f32 %v2495_v27, %v2495_v27 }
 0x13b   :  { %v2523_v51 = vpop.f32.mrf.mxu0  ;;  %v2525_v52 = vpop.f32.mrf.mxu1 }
 0x13c   :  { %v1972_v53 = vpack.c.bf16 %v2523_v51, %v2519_v47  ;;  %v2052_v54 = vpack.c.bf16 %v2525_v52, %v2521_v48 }
 0x13d   :  { %v620_v55 = vpop.f32.mrf.mxu0  ;;  %v748_v56 = vpop.f32.mrf.mxu1 }
 0x13e   :  { %2116 = vst [vmem:[#allocation8 + $0x18] sm:$0xff] %v1972_v53   ;;  %2132 = vst [vmem:[#allocation8 + $0x98] sm:$0xff] %v2052_v54   ;;  %v1497_v54 = vadd.f32 %v2487_v21, %v2483_v17  ;;  %v1631_v55 = vadd.f32 %v1568_v43, %v1567_v46  ;;  %v1570_v56 = vmul.f32 %v2499_v31, %v2499_v31 }
 0x13f   :  { %v2531_v57 = vpop.f32.mrf.mxu0  ;;  %v2533_v58 = vpop.f32.mrf.mxu1 }
 0x141   :  { %v625_v59 = vpop.f32.mrf.mxu0  ;;  %v753_v60 = vpop.f32.mrf.mxu1 }
 0x143   :  { %v2535_v61 = vpop.f32.mrf.mxu0  ;;  %v2537_v62 = vpop.f32.mrf.mxu1 }
 0x144   :  { %v1977_v63 = vpack.c.bf16 %v2535_v61, %v2531_v57  ;;  %v2057_v0 = vpack.c.bf16 %v2537_v62, %v2533_v58 }
 0x145   :  { %v628_v1 = vpop.f32.mrf.mxu0  ;;  %v756_v2 = vpop.f32.mrf.mxu1 }
 0x146   :  { %2117 = vst [vmem:[#allocation8 + $0x20] sm:$0xff] %v1977_v63   ;;  %2133 = vst [vmem:[#allocation8 + $0xa0] sm:$0xff] %v2057_v0   ;;  %v1498_v63 = vadd.f32 %v1497_v54, %v2495_v27  ;;  %v1632_v0 = vadd.f32 %v1631_v55, %v1569_v49  ;;  %v1571_v1 = vmul.f32 %v2507_v37, %v2507_v37 }
 0x147   :  { %v2543_v3 = vpop.f32.mrf.mxu0  ;;  %v2545_v4 = vpop.f32.mrf.mxu1  ;;  %v1572_v27 = vmul.f32 %v2511_v41, %v2511_v41 }
 0x149   :  { %v633_v5 = vpop.f32.mrf.mxu0  ;;  %v761_v6 = vpop.f32.mrf.mxu1 }
 0x14a   :  { %v1499_v6 = vadd.f32 %v1498_v63, %v2499_v31  ;;  %v1573_v31 = vmul.f32 %v2519_v47, %v2519_v47 }
 0x14b   :  { %v2547_v7 = vpop.f32.mrf.mxu0  ;;  %v2549_v8 = vpop.f32.mrf.mxu1 }
 0x14c   :  { %v1982_v9 = vpack.c.bf16 %v2547_v7, %v2543_v3  ;;  %v2062_v10 = vpack.c.bf16 %v2549_v8, %v2545_v4 }
 0x14d   :  { %v636_v11 = vpop.f32.mrf.mxu0  ;;  %v764_v12 = vpop.f32.mrf.mxu1 }
 0x14e   :  { %2118 = vst [vmem:[#allocation8 + $0x28] sm:$0xff] %v1982_v9   ;;  %2134 = vst [vmem:[#allocation8 + $0xa8] sm:$0xff] %v2062_v10   ;;  %v1633_v9 = vadd.f32 %v1632_v0, %v1570_v56  ;;  %v1500_v12 = vadd.f32 %v1499_v6, %v2507_v37  ;;  %v1578_v6 = vmul.f32 %v2547_v7, %v2547_v7 }
 0x14f   :  { %v2555_v13 = vpop.f32.mrf.mxu0  ;;  %v2557_v14 = vpop.f32.mrf.mxu1 }
 0x151   :  { %v641_v15 = vpop.f32.mrf.mxu0  ;;  %v769_v16 = vpop.f32.mrf.mxu1 }
 0x152   :  { %v1634_v15 = vadd.f32 %v1633_v9, %v1571_v1 }
 0x153   :  { %v2559_v19 = vpop.f32.mrf.mxu0  ;;  %v2561_v20 = vpop.f32.mrf.mxu1 }
 0x154   :  { %v1987_v23 = vpack.c.bf16 %v2559_v19, %v2555_v13  ;;  %v2067_v24 = vpack.c.bf16 %v2561_v20, %v2557_v14 }
 0x155   :  { %v644_v25 = vpop.f32.mrf.mxu0  ;;  %v772_v26 = vpop.f32.mrf.mxu1 }
 0x156   :  { %2119 = vst [vmem:[#allocation8 + $0x30] sm:$0xff] %v1987_v23   ;;  %2135 = vst [vmem:[#allocation8 + $0xb0] sm:$0xff] %v2067_v24   ;;  %v1501_v24 = vadd.f32 %v1500_v12, %v2511_v41  ;;  %v1635_v25 = vadd.f32 %v1634_v15, %v1572_v27  ;;  %v1574_v26 = vmul.f32 %v2523_v51, %v2523_v51 }
 0x157   :  { %v2567_v29 = vpop.f32.mrf.mxu0  ;;  %v2569_v30 = vpop.f32.mrf.mxu1  ;;  %v1579_v27 = vmul.f32 %v2555_v13, %v2555_v13 }
 0x158   :  { %v1502_v37 = vadd.f32 %v1501_v24, %v2519_v47  ;;  %v1576_v47 = vmul.f32 %v2535_v61, %v2535_v61 }
 0x159   :  { %v649_v33 = vpop.f32.mrf.mxu0  ;;  %v777_v34 = vpop.f32.mrf.mxu1 }
 0x15b   :  { %v2571_v35 = vpop.f32.mrf.mxu0  ;;  %v2573_v36 = vpop.f32.mrf.mxu1 }
 0x15c   :  { %v1992_v39 = vpack.c.bf16 %v2571_v35, %v2567_v29  ;;  %v2072_v40 = vpack.c.bf16 %v2573_v36, %v2569_v30 }
 0x15d   :  { %v652_v44 = vpop.f32.mrf.mxu0  ;;  %v780_v45 = vpop.f32.mrf.mxu1 }
 0x15e   :  { %2120 = vst [vmem:[#allocation8 + $0x38] sm:$0xff] %v1992_v39   ;;  %2136 = vst [vmem:[#allocation8 + $0xb8] sm:$0xff] %v2072_v40   ;;  %v1636_v39 = vadd.f32 %v1635_v25, %v1573_v31  ;;  %v1575_v40 = vmul.f32 %v2531_v57, %v2531_v57  ;;  %v1503_v45 = vadd.f32 %v1502_v37, %v2523_v51 }
 0x15f   :  { %v2585_v50 = vpop.f32.mrf.mxu0  ;;  %v2587_v53 = vpop.f32.mrf.mxu1  ;;  %v1577_v51 = vmul.f32 %v2543_v3, %v2543_v3 }
 0x160   :  { %v1637_v49 = vadd.f32 %v1636_v39, %v1574_v26  ;;  %v1504_v56 = vadd.f32 %v1503_v45, %v2531_v57  ;;  %v1582_v45 = vmul.f32 %v2571_v35, %v2571_v35 }
 0x161   :  { %v657_v59 = vpop.f32.mrf.mxu0  ;;  %v785_v60 = vpop.f32.mrf.mxu1 }
 0x162   :  { %v1638_v59 = vadd.f32 %v1637_v49, %v1575_v40  ;;  %v1505_v0 = vadd.f32 %v1504_v56, %v2535_v61 }
 0x163   :  { %v2596_v2 = vpop.f32.mrf.mxu0  ;;  %v2598_v5 = vpop.f32.mrf.mxu1 }
 0x164   :  { %v1997_v17 = vpack.c.bf16 %v2596_v2, %v2585_v50  ;;  %v2077_v21 = vpack.c.bf16 %v2598_v5, %v2587_v53  ;;  %v1639_v1 = vadd.f32 %v1638_v59, %v1576_v47  ;;  %v1506_v57 = vadd.f32 %v1505_v0, %v2543_v3 }
 0x165   :  { %v660_v10 = vpop.f32.mrf.mxu0  ;;  %v788_v11 = vpop.f32.mrf.mxu1  ;;  %v1580_v3 = vmul.f32 %v2559_v19, %v2559_v19  ;;  %v1583_v47 = vmul.f32 %v2585_v50, %v2585_v50  ;;  %v1584_v0 = vmul.f32 %v2596_v2, %v2596_v2 }
 0x166   :  { %2121 = vst [vmem:[#allocation8 + $0x40] sm:$0xff] %v1997_v17   ;;  %2137 = vst [vmem:[#allocation8 + $0xc0] sm:$0xff] %v2077_v21   ;;  %v1640_v9 = vadd.f32 %v1639_v1, %v1577_v51  ;;  %v1507_v12 = vadd.f32 %v1506_v57, %v2547_v7  ;;  %v1581_v7 = vmul.f32 %v2567_v29, %v2567_v29 }
 0x167   :  { %v2610_v16 = vpop.f32.mrf.mxu0  ;;  %v2612_v23 = vpop.f32.mrf.mxu1 }
 0x168   :  { %v1641_v31 = vadd.f32 %v1640_v9, %v1578_v6  ;;  %v1508_v26 = vadd.f32 %v1507_v12, %v2555_v13 }
 0x169   :  { %v665_v33 = vpop.f32.mrf.mxu0  ;;  %v793_v34 = vpop.f32.mrf.mxu1 }
 0x16a   :  { %v1642_v33 = vadd.f32 %v1641_v31, %v1579_v27  ;;  %v1509_v39 = vadd.f32 %v1508_v26, %v2559_v19 }
 0x16b   :  { %v2620_v43 = vpop.f32.mrf.mxu0  ;;  %v2622_v44 = vpop.f32.mrf.mxu1 }
 0x16c   :  { %v2002_v41 = vpack.c.bf16 %v2620_v43, %v2610_v16  ;;  %v2082_v46 = vpack.c.bf16 %v2622_v44, %v2612_v23  ;;  %v1643_v40 = vadd.f32 %v1642_v33, %v1580_v3  ;;  %v1510_v49 = vadd.f32 %v1509_v39, %v2567_v29 }
 0x16d   :  { %v668_v54 = vpop.f32.mrf.mxu0  ;;  %v796_v55 = vpop.f32.mrf.mxu1  ;;  %v1586_v12 = vmul.f32 %v2620_v43, %v2620_v43 }
 0x16e   :  { %2122 = vst [vmem:[#allocation8 + $0x48] sm:$0xff] %v2002_v41   ;;  %2138 = vst [vmem:[#allocation8 + $0xc8] sm:$0xff] %v2082_v46   ;;  %v1644_v13 = vadd.f32 %v1643_v40, %v1581_v7  ;;  %v1511_v56 = vadd.f32 %v1510_v49, %v2571_v35 }
 0x16f   :  { %v2634_v60 = vpop.f32.mrf.mxu0  ;;  %v2636_v63 = vpop.f32.mrf.mxu1 }
 0x170   :  { %v1645_v51 = vadd.f32 %v1644_v13, %v1582_v45  ;;  %v1512_v29 = vadd.f32 %v1511_v56, %v2585_v50  ;;  %v1587_v3 = vmul.f32 %v2634_v60, %v2634_v60 }
 0x171   :  { %v673_v17 = vpop.f32.mrf.mxu0  ;;  %v801_v21 = vpop.f32.mrf.mxu1 }
 0x172   :  { %v1646_v17 = vadd.f32 %v1645_v51, %v1583_v47  ;;  %v1585_v21 = vmul.f32 %v2610_v16, %v2610_v16  ;;  %v1513_v9 = vadd.f32 %v1512_v29, %v2596_v2 }
 0x173   :  { %v2644_v10 = vpop.f32.mrf.mxu0  ;;  %v2646_v11 = vpop.f32.mrf.mxu1 }
 0x174   :  { %v2007_v61 = vpack.c.bf16 %v2644_v10, %v2634_v60  ;;  %v2087_v15 = vpack.c.bf16 %v2646_v11, %v2636_v63  ;;  %v1647_v27 = vadd.f32 %v1646_v17, %v1584_v0  ;;  %v1514_v31 = vadd.f32 %v1513_v9, %v2610_v16 }
 0x175   :  { %v676_v24 = vpop.f32.mrf.mxu0  ;;  %v804_v25 = vpop.f32.mrf.mxu1  ;;  %v1588_v39 = vmul.f32 %v2644_v10, %v2644_v10 }
 0x176   :  { %2123 = vst [vmem:[#allocation8 + $0x50] sm:$0xff] %v2007_v61   ;;  %2139 = vst [vmem:[#allocation8 + $0xd0] sm:$0xff] %v2087_v15   ;;  %v1648_v50 = vadd.f32 %v1647_v27, %v1585_v21  ;;  %v1515_v26 = vadd.f32 %v1514_v31, %v2620_v43 }
 0x177   :  { %v679_v34 = vpop.f32.mrf.mxu0  ;;  %v2658_v37 = vpop.f32.mrf.mxu1 }
 0x178   :  { %v1649_v7 = vadd.f32 %v1648_v50, %v1586_v12  ;;  %v1516_v16 = vadd.f32 %v1515_v26, %v2634_v60 }
 0x179   :  { %v681_v41 = vpop.f32.mrf.mxu0  ;;  %v809_v46 = vpop.f32.mrf.mxu1 }
 0x17a   :  { %v1650_v41 = vadd.f32 %v1649_v7, %v1587_v3  ;;  %v1589_v46 = vmul.f32 %v679_v34, %v679_v34  ;;  %v1517_v43 = vadd.f32 %v1516_v16, %v2644_v10 }
 0x17b   :  { %v682_v54 = vpop.f32.mrf.mxu0  ;;  %v2666_v55 = vpop.f32.mrf.mxu1 }
 0x17c   :  { %v2012_v59 = vpack.c.bf16 %v682_v54, %v679_v34  ;;  %v2092_v19 = vpack.c.bf16 %v2666_v55, %v2658_v37  ;;  %v1651_v47 = vadd.f32 %v1650_v41, %v1588_v39  ;;  %v1590_v56 = vmul.f32 %v682_v54, %v682_v54 }
 0x17d   :  { %v684_v1 = vpop.f32.mrf.mxu0  ;;  %v812_v6 = vpop.f32.mrf.mxu1  ;;  %v1518_v51 = vadd.f32 %v1517_v43, %v679_v34 }
 0x17e   :  { %2124 = vst [vmem:[#allocation8 + $0x58] sm:$0xff] %v2012_v59   ;;  %2140 = vst [vmem:[#allocation8 + $0xd8] sm:$0xff] %v2092_v19   ;;  %v1652_v0 = vadd.f32 %v1651_v47, %v1589_v46 }
 0x17f   :  { %v687_v57 = vpop.f32.mrf.mxu0  ;;  %v2676_v35 = vpop.f32.mrf.mxu1  ;;  %v1519_v60 = vadd.f32 %v1518_v51, %v682_v54 }
 0x180   :  { %v1591_v1 = vmul.f32 %v687_v57, %v687_v57  ;;  %v1653_v9 = vadd.f32 %v1652_v0, %v1590_v56 }
 0x181   :  { %v689_v61 = vpop.f32.mrf.mxu0  ;;  %v817_v15 = vpop.f32.mrf.mxu1  ;;  %v1520_v10 = vadd.f32 %v1519_v60, %v687_v57 }
 0x182   :  { %v1654_v15 = vadd.f32 %v1653_v9, %v1591_v1 }
 0x183   :  { %v690_v24 = vpop.f32.mrf.mxu0  ;;  %v2684_v25 = vpop.f32.mrf.mxu1 }
 0x184   :  { %v2017_v33 = vpack.c.bf16 %v690_v24, %v687_v57  ;;  %v2097_v2 = vpack.c.bf16 %v2684_v25, %v2676_v35  ;;  %v1592_v27 = vmul.f32 %v690_v24, %v690_v24  ;;  %v1521_v3 = vadd.f32 %v1520_v10, %v690_v24 }
 0x185   :  { %v692_v40 = vpop.f32.mrf.mxu0  ;;  %v820_v45 = vpop.f32.mrf.mxu1 }
 0x186   :  { %2125 = vst [vmem:[#allocation8 + $0x60] sm:$0xff] %v2017_v33   ;;  %2141 = vst [vmem:[#allocation8 + $0xe0] sm:$0xff] %v2097_v2   ;;  %v1655_v26 = vadd.f32 %v1654_v15, %v1592_v27 }
 0x187   :  { %v695_v49 = vpop.f32.mrf.mxu0  ;;  %v2692_v13 = vpop.f32.mrf.mxu1 }
 0x188   :  { %v1593_v31 = vmul.f32 %v695_v49, %v695_v49  ;;  %v1522_v7 = vadd.f32 %v1521_v3, %v695_v49 }
 0x189   :  { %v697_v59 = vpop.f32.mrf.mxu0  ;;  %v825_v19 = vpop.f32.mrf.mxu1 }
 0x18a   :  { %v1656_v39 = vadd.f32 %v1655_v26, %v1593_v31  ;;  %v1599_v26 = vmul.f32 %v2485_v18, %v2485_v18 }
 0x18b   :  { %v698_v6 = vpop.f32.mrf.mxu0  ;;  %v2695_v29 = vpop.f32.mrf.mxu1 }
 0x18c   :  { %v2022_v17 = vpack.c.bf16 %v698_v6, %v695_v49  ;;  %v2102_v21 = vpack.c.bf16 %v2695_v29, %v2692_v13  ;;  %v1594_v33 = vmul.f32 %v698_v6, %v698_v6  ;;  %v1523_v41 = vadd.f32 %v1522_v7, %v698_v6 }
 0x18d   :  { %v700_v12 = vpop.f32.mrf.mxu0  ;;  %v828_v61 = vpop.f32.mrf.mxu1 }
 0x18e   :  { %2126 = vst [vmem:[#allocation8 + $0x68] sm:$0xff] %v2022_v17   ;;  %2142 = vst [vmem:[#allocation8 + $0xe8] sm:$0xff] %v2102_v21   ;;  %v1657_v43 = vadd.f32 %v1656_v39, %v1594_v33 }
 0x18f   :  { %v703_v34 = vpop.f32.mrf.mxu0  ;;  %v2699_v50 = vpop.f32.mrf.mxu1 }
 0x190   :  { %v1595_v40 = vmul.f32 %v703_v34, %v703_v34  ;;  %v1524_v24 = vadd.f32 %v1523_v41, %v703_v34 }
 0x191   :  { %v705_v54 = vpop.f32.mrf.mxu0  ;;  %v833_v2 = vpop.f32.mrf.mxu1 }
 0x192   :  { %v1658_v19 = vadd.f32 %v1657_v43, %v1595_v40 }
 0x193   :  { %v706_v45 = vpop.f32.mrf.mxu0  ;;  %v2701_v16 = vpop.f32.mrf.mxu1 }
 0x194   :  { %v2027_v57 = vpack.c.bf16 %v706_v45, %v703_v34  ;;  %v2107_v46 = vpack.c.bf16 %v2701_v16, %v2699_v50  ;;  %v1596_v47 = vmul.f32 %v706_v45, %v706_v45  ;;  %v1525_v0 = vadd.f32 %v1524_v24, %v706_v45 }
 0x195   :  { %v708_v56 = vpop.f32.mrf.mxu0  ;;  %v836_v59 = vpop.f32.mrf.mxu1 }
 0x196   :  { %2127 = vst [vmem:[#allocation8 + $0x70] sm:$0xff] %v2027_v57   ;;  %2143 = vst [vmem:[#allocation8 + $0xf0] sm:$0xff] %v2107_v46   ;;  %v1659_v60 = vadd.f32 %v1658_v19, %v1596_v47 }
 0x197   :  { %v711_v51 = vpop.f32.mrf.mxu0  ;;  %v2705_v49 = vpop.f32.mrf.mxu1 }
 0x198   :  { %v1597_v1 = vmul.f32 %v711_v51, %v711_v51  ;;  %v1526_v21 = vadd.f32 %v1525_v0, %v711_v51 }
 0x199   :  { %v713_v17 = vpop.f32.mrf.mxu0  ;;  %v841_v6 = vpop.f32.mrf.mxu1 }
 0x19a   :  { %v1660_v9 = vadd.f32 %v1659_v60, %v1597_v1 }
 0x19b   :  { %v714_v27 = vpop.f32.mrf.mxu0  ;;  %v2707_v12 = vpop.f32.mrf.mxu1 }
 0x19c   :  { %v2032_v61 = vpack.c.bf16 %v714_v27, %v711_v51  ;;  %v1527_v10 = vadd.f32 %v1526_v21, %v714_v27  ;;  %v1598_v15 = vmul.f32 %v714_v27, %v714_v27  ;;  %v2112_v31 = vpack.c.bf16 %v2707_v12, %v2705_v49 }
 0x19d   :  { %v716_v34 = vpop.f32.mrf.mxu0  ;;  %v844_v3 = vpop.f32.mrf.mxu1 }
 0x19e   :  { %2128 = vst [vmem:[#allocation8 + $0x78] sm:$0xff] %v2032_v61   ;;  %v1528_v33 = vadd.f32 %v1527_v10, %v2485_v18  ;;  %v1661_v54 = vadd.f32 %v1660_v9, %v1598_v15  ;;  %2144 = vst [vmem:[#allocation8 + $0xf8] sm:$0xff] %v2112_v31  }
 0x19f   :  { %2350 = shalt.err (!%p2347_p0)
}
 0x1a0   :  { %1712 = dma.vmem_to_hbm [thread:$0]  %s1707_s1, 4096, %s2821_s2, [#allocation5], %s2411_s25, %s2411_s25, %s2412_s26   ;;  %v1600_v2 = vmul.f32 %v2489_v22, %v2489_v22  ;;  %v1529_v18 = vadd.f32 %v1528_v33, %v2489_v22  ;;  %v1662_v7 = vadd.f32 %v1661_v54, %v1599_v26  ;;  %v1601_v39 = vmul.f32 %v2497_v28, %v2497_v28 }
 0x1a1   :  { %v1602_v41 = vmul.f32 %v2501_v32, %v2501_v32  ;;  %v1603_v43 = vmul.f32 %v2509_v38, %v2509_v38  ;;  %v1604_v22 = vmul.f32 %v2513_v42, %v2513_v42  ;;  %s2415_s2 = smov [#allocation9]   ;;  %s2416_s7 = smov [#allocation11]  }
 0x1a2   :  { %v1530_v40 = vadd.f32 %v1529_v18, %v2497_v28  ;;  %v1663_v45 = vadd.f32 %v1662_v7, %v1600_v2  ;;  %v1605_v28 = vmul.f32 %v2521_v48, %v2521_v48  ;;  %s1719_s6 = sshll.u32 %s2415_s2, 4  ;;  %s1729_s8 = sshll.u32 %s2416_s7, 4  ;;  %s1720_s6 = int_to_ptr.vmem [resolvable:$true] %s1719_s6  ;;  %s1730_s8 = int_to_ptr.vmem [resolvable:$true] %s1729_s8 }
 0x1a3   :  { %s2359_s9 = scalar_lea.vmem %s1720_s6, 16  ;;  %s2363_s10 = scalar_lea.vmem %s1720_s6, 32 }
 0x1a4   :  { %v1531_v57 = vadd.f32 %v1530_v40, %v2501_v32  ;;  %v1664_v46 = vadd.f32 %v1663_v45, %v1601_v39  ;;  %v1606_v32 = vmul.f32 %v2525_v52, %v2525_v52  ;;  %v1616_v39 = vmul.f32 %v2598_v5, %v2598_v5  ;;  %p2360_p1 = scmp.ne.s32.totalorder %s1720_s6, %s2359_s9  ;;  %p2364_p2 = scmp.lt.s32.totalorder %s1720_s6, %s1720_s6 }
 0x1a5   :  { %p2365_p3 = scmp.lt.s32.totalorder %s2363_s10, %s2359_s9 }
 0x1a6   :  { %v1532_v47 = vadd.f32 %v1531_v57, %v2509_v38  ;;  %v1665_v56 = vadd.f32 %v1664_v46, %v1602_v41  ;;  %v1607_v38 = vmul.f32 %v2533_v58, %v2533_v58  ;;  %v1617_v41 = vmul.f32 %v2612_v23, %v2612_v23 }
 0x1a7   :  { %v1618_v46 = vmul.f32 %v2622_v44, %v2622_v44  ;;  %p2366_p4 = por %p2365_p3, %p2364_p2 }
 0x1a8   :  { %v1533_v59 = vadd.f32 %v1532_v47, %v2513_v42  ;;  %v1666_v24 = vadd.f32 %v1665_v56, %v1603_v43  ;;  %v1608_v42 = vmul.f32 %v2537_v62, %v2537_v62  ;;  %v1619_v47 = vmul.f32 %v2636_v63, %v2636_v63 }
 0x1a9   :  { %p2367_p5 = pnand %p2366_p4, %p2360_p1 }
 0x1aa   :  { %v1534_v19 = vadd.f32 %v1533_v59, %v2521_v48  ;;  %v1667_v51 = vadd.f32 %v1666_v24, %v1604_v22  ;;  %v1609_v48 = vmul.f32 %v2545_v4, %v2545_v4  ;;  %v1620_v22 = vmul.f32 %v2646_v11, %v2646_v11 }
 0x1ab   :  { %v1621_v24 = vmul.f32 %v2658_v37, %v2658_v37 }
 0x1ac   :  { %v1535_v0 = vadd.f32 %v1534_v19, %v2525_v52  ;;  %v1668_v1 = vadd.f32 %v1667_v51, %v1605_v28  ;;  %v1610_v52 = vmul.f32 %v2549_v8, %v2549_v8  ;;  %v1622_v19 = vmul.f32 %v2666_v55, %v2666_v55 }
 0x1ae   :  { %v1669_v60 = vadd.f32 %v1668_v1, %v1606_v32  ;;  %v1536_v17 = vadd.f32 %v1535_v0, %v2533_v58  ;;  %v1611_v58 = vmul.f32 %v2557_v14, %v2557_v14  ;;  %v1623_v32 = vmul.f32 %v2676_v35, %v2676_v35 }
 0x1af   :  { %v1624_v1 = vmul.f32 %v2684_v25, %v2684_v25 }
 0x1b0   :  { %v1537_v6 = vadd.f32 %v1536_v17, %v2537_v62  ;;  %v1670_v21 = vadd.f32 %v1669_v60, %v1607_v38  ;;  %v1612_v62 = vmul.f32 %v2561_v20, %v2561_v20  ;;  %v1625_v60 = vmul.f32 %v2692_v13, %v2692_v13 }
 0x1b2   :  { %v1538_v9 = vadd.f32 %v1537_v6, %v2545_v4  ;;  %v1671_v27 = vadd.f32 %v1670_v21, %v1608_v42  ;;  %v1613_v4 = vmul.f32 %v2569_v30, %v2569_v30  ;;  %v1626_v42 = vmul.f32 %v2695_v29, %v2695_v29 }
 0x1b3   :  { %v1627_v21 = vmul.f32 %v2699_v50, %v2699_v50 }
 0x1b4   :  { %v1539_v61 = vadd.f32 %v1538_v9, %v2549_v8  ;;  %v1672_v10 = vadd.f32 %v1671_v27, %v1609_v48  ;;  %v1614_v8 = vmul.f32 %v2573_v36, %v2573_v36  ;;  %v1628_v9 = vmul.f32 %v2701_v16, %v2701_v16 }
 0x1b6   :  { %v1540_v15 = vadd.f32 %v1539_v61, %v2557_v14  ;;  %v1673_v31 = vadd.f32 %v1672_v10, %v1610_v52  ;;  %v1615_v14 = vmul.f32 %v2587_v53, %v2587_v53  ;;  %v1629_v52 = vmul.f32 %v2705_v49, %v2705_v49 }
 0x1b7   :  { %v1630_v10 = vmul.f32 %v2707_v12, %v2707_v12 }
 0x1b8   :  { %v1541_v34 = vadd.f32 %v1540_v15, %v2561_v20  ;;  %v1674_v3 = vadd.f32 %v1673_v31, %v1611_v58 }
 0x1ba   :  { %v1542_v26 = vadd.f32 %v1541_v34, %v2569_v30  ;;  %v1675_v33 = vadd.f32 %v1674_v3, %v1612_v62 }
 0x1bc   :  { %v1543_v54 = vadd.f32 %v1542_v26, %v2573_v36  ;;  %v1676_v2 = vadd.f32 %v1675_v33, %v1613_v4 }
 0x1be   :  { %v1544_v18 = vadd.f32 %v1543_v54, %v2587_v53  ;;  %v1677_v7 = vadd.f32 %v1676_v2, %v1614_v8 }
 0x1c0   :  { %v1545_v20 = vadd.f32 %v1544_v18, %v2598_v5  ;;  %v1678_v40 = vadd.f32 %v1677_v7, %v1615_v14 }
 0x1c2   :  { %v1679_v30 = vadd.f32 %v1678_v40, %v1616_v39  ;;  %v1546_v45 = vadd.f32 %v1545_v20, %v2612_v23 }
 0x1c4   :  { %v1680_v36 = vadd.f32 %v1679_v30, %v1617_v41  ;;  %v1547_v57 = vadd.f32 %v1546_v45, %v2622_v44 }
 0x1c6   :  { %v1681_v53 = vadd.f32 %v1680_v36, %v1618_v46  ;;  %v1548_v43 = vadd.f32 %v1547_v57, %v2636_v63 }
 0x1c8   :  { %v1682_v5 = vadd.f32 %v1681_v53, %v1619_v47  ;;  %v1549_v56 = vadd.f32 %v1548_v43, %v2646_v11 }
 0x1ca   :  { %v1683_v59 = vadd.f32 %v1682_v5, %v1620_v22  ;;  %v1550_v23 = vadd.f32 %v1549_v56, %v2658_v37 }
 0x1cc   :  { %v1684_v28 = vadd.f32 %v1683_v59, %v1621_v24  ;;  %v1551_v44 = vadd.f32 %v1550_v23, %v2666_v55 }
 0x1ce   :  { %v1685_v51 = vadd.f32 %v1684_v28, %v1622_v19  ;;  %v1552_v63 = vadd.f32 %v1551_v44, %v2676_v35 }
 0x1d0   :  { %v1686_v0 = vadd.f32 %v1685_v51, %v1623_v32  ;;  %v1553_v11 = vadd.f32 %v1552_v63, %v2684_v25 }
 0x1d2   :  { %v1687_v38 = vadd.f32 %v1686_v0, %v1624_v1  ;;  %v1554_v37 = vadd.f32 %v1553_v11, %v2692_v13 }
 0x1d4   :  { %v1688_v17 = vadd.f32 %v1687_v38, %v1625_v60  ;;  %v1555_v55 = vadd.f32 %v1554_v37, %v2695_v29 }
 0x1d6   :  { %v1689_v6 = vadd.f32 %v1688_v17, %v1626_v42  ;;  %v1556_v35 = vadd.f32 %v1555_v55, %v2699_v50 }
 0x1d8   :  { %v1690_v48 = vadd.f32 %v1689_v6, %v1627_v21  ;;  %v1557_v25 = vadd.f32 %v1556_v35, %v2701_v16 }
 0x1da   :  { %v1691_v27 = vadd.f32 %v1690_v48, %v1628_v9  ;;  %v1558_v13 = vadd.f32 %v1557_v25, %v2705_v49 }
 0x1dc   :  { %v1692_v61 = vadd.f32 %v1691_v27, %v1629_v52  ;;  %v1559_v29 = vadd.f32 %v1558_v13, %v2707_v12 }
 0x1de   :  { %v1560_v58 = vrot.slane %v1559_v29, 4  ;;  %v1693_v50 = vadd.f32 %v1692_v61, %v1630_v10 }
 0x1e0   :  { %v1561_v15 = vadd.f32 %v1560_v58, %v1559_v29  ;;  %v1694_v31 = vrot.slane %v1693_v50, 4 }
 0x1e2   :  { %v1562_v62 = vrot.slane %v1561_v15, 2  ;;  %v1695_v34 = vadd.f32 %v1694_v31, %v1693_v50 }
 0x1e4   :  { %v1563_v3 = vadd.f32 %v1562_v62, %v1561_v15  ;;  %v1696_v16 = vrot.slane %v1695_v34, 2 }
 0x1e6   :  { %v1564_v4 = vrot.slane %v1563_v3, 1  ;;  %v1697_v26 = vadd.f32 %v1696_v16, %v1695_v34 }
 0x1e8   :  { %v1565_v49 = vadd.f32 %v1564_v4, %v1563_v3  ;;  %v1698_v33 = vrot.slane %v1697_v26, 1 }
 0x1ea   :  { %1566 = vst [vmem:[#allocation9] sm:$0x1] %v1565_v49  ;;  %v1699_v8 = vadd.f32 %v1698_v33, %v1697_v26 }
 0x1eb   :  { %2370 = shalt.err (!%p2367_p5)
}
 0x1ec   :  { %1722 = dma.vmem_to_hbm [thread:$0]  %s1720_s6, 16, %s2822_s3, [#allocation10]   ;;  %1700 = vst [vmem:[#allocation11] sm:$0x1] %v1699_v8 }
 0x1ed   :  { %s2379_s13 = scalar_lea.vmem %s1730_s8, 16  ;;  %s2383_s14 = scalar_lea.vmem %s1730_s8, 32 }
 0x1ee   :  { %p2380_p6 = scmp.ne.s32.totalorder %s1730_s8, %s2379_s13  ;;  %p2384_p7 = scmp.lt.s32.totalorder %s1730_s8, %s1730_s8 }
 0x1ef   :  { %p2385_p8 = scmp.lt.s32.totalorder %s2383_s14, %s2379_s13 }
 0x1f1   :  { %p2386_p9 = por %p2385_p8, %p2384_p7 }
 0x1f3   :  { %p2387_p10 = pnand %p2386_p9, %p2380_p6 }
 0x1f5   :  { %2390 = shalt.err (!%p2387_p10)
}
 0x1f6   :  { %1732 = dma.vmem_to_hbm [thread:$0]  %s1730_s8, 16, %s2823_s4, [#allocation10]  }
 0x1f7   :  { %2403 = dma.done.wait [#allocation5], 4096  }
 0x1f8   :  { %2404 = vsyncadd [#allocation5], 4294963200 }
 0x1f9   :  { %2405 = dma.done.wait [#allocation10], 32  }
 0x1fa   :  { %2406 = vsyncadd [#allocation10], 4294967264 }
 0x1fb   :  { %1742 = vsyncpa [#allocation4], 1 }
 0x1fc   :  { %1743 = vsyncpa [#allocation7], 1 }
 0x1fd   :  { %1744 = vsyncpa [#allocation5], 1 }
 0x1fe   :  { %1745 = vsyncpa [#allocation10], 1 }

</bundles_post_ra>
